<compile_context>
chip_gen: v5e
topology: v5e:2x2
jax: 0.10.0
libtpu: 0.0.40
codegen_flags: <defaults>
</compile_context>

<pallas_src>
import functools

import jax
import jax.numpy as jnp
from jax.experimental import pallas as pl
from jax.experimental.pallas import tpu as pltpu

_LANES = 128
_ACC_SUBLANES = 8  # f32 accumulator vreg shape


def _cdiv(a, b):
    return -(-a // b)


def _round_down(a, b):
    return (a // b) * b


def _sublane_multiple(dtype) -> int:
    """Minimum second-minor tile multiple for a dtype (packs along sublanes)."""
    itemsize = jnp.dtype(dtype).itemsize
    return {4: 8, 2: 16, 1: 32}.get(itemsize, 8)


def _tensorcores_per_chip() -> int:
    """2 on dual-TensorCore v7x, else 1 (v5e/v6e are single-TC)."""
    try:
        kind = jax.devices()[0].device_kind.lower()
    except Exception:  # non-TPU backends / interpret mode
        return 1
    return 2 if "v7" in kind else 1


def _default_tile_bytes() -> int:
    # Bigger blocks on v7x: higher HBM BW makes the fixed ~0.35us/step cost
    # proportionally larger; 2 inputs x 2 buffers x 4 MiB stays well under the
    # ~40 MiB budget we allow out of 64 MiB/TC VMEM.  2 MiB elsewhere.
    return (4 << 20) if _tensorcores_per_chip() == 2 else (2 << 20)


def _make_mse_partial_kernel(total_rows, tr, blocks_per_split, needs_mask):
    def kernel(x_ref, t_ref, out_ref):
        i = pl.program_id(1)  # reduction axis (last)

        @pl.when(i == 0)
        def _():
            out_ref[...] = jnp.zeros_like(out_ref)

        d = x_ref[...].astype(jnp.float32) - t_ref[...].astype(jnp.float32)
        if needs_mask:
            # Mask invalid rows BEFORE squaring.  Only the (globally) last
            # block is ragged; blocks whose unclamped start is past
            # `total_rows` (possible when the 2-way split does not divide the
            # block count) are fully masked to zero.
            c = pl.program_id(0)
            row_start = (c * blocks_per_split + i) * tr
            row_ids = row_start + jax.lax.broadcasted_iota(
                jnp.int32, (tr, _LANES), 0)
            d = jnp.where(row_ids < total_rows, d, 0.0)
        sq = d * d
        # Fold the (tr, 128) tile onto the (8, 128) accumulator: tr//8
        # elementwise vreg adds on the VPU -- no XLU reduce in the hot loop.
        out_ref[0, :, :] += jnp.sum(
            sq.reshape(-1, _ACC_SUBLANES, _LANES), axis=0)

    return kernel


@functools.partial(
    jax.jit, static_argnames=("tile_bytes", "num_splits", "min_pallas_bytes"))
def content_loss_forward(x, target, *, tile_bytes=None, num_splits=None,
                         min_pallas_bytes=1 << 20):
    """Returns (input, loss) where loss = mean((input - target)^2)."""
    assert x.shape == target.shape
    n_elems = x.size
    itemsize = jnp.dtype(x.dtype).itemsize
    sub = _sublane_multiple(x.dtype)
    quantum = sub * _LANES                 # elements per fully aligned row group
    main = _round_down(n_elems, quantum)   # Pallas handles this prefix
    rows = main // _LANES                  # multiple of `sub`

    # Small inputs: a fused XLA reduction beats pallas_call fixed cost.
    if rows == 0 or n_elems * itemsize < min_pallas_bytes:
        d = x.astype(jnp.float32) - target.astype(jnp.float32)
        return x, jnp.sum(d * d) / jnp.float32(n_elems)

    if tile_bytes is None:
        tile_bytes = _default_tile_bytes()
    if num_splits is None:
        num_splits = _tensorcores_per_chip()

    tile_rows = max(sub, _round_down(tile_bytes // (_LANES * itemsize), sub))
    tr = min(tile_rows, rows)              # multiple of `sub`, <= rows
    total_blocks = _cdiv(rows, tr)
    num_splits = max(1, min(num_splits, total_blocks))
    blocks_per_split = _cdiv(total_blocks, num_splits)
    needs_clamp = num_splits * blocks_per_split != total_blocks
    needs_mask = num_splits * blocks_per_split * tr != rows

    xf = x.reshape(-1)
    tf = target.reshape(-1)
    tail = n_elems - main
    if tail:
        # Sub-aligned tail (< sub*128 elements, < 16 KiB) reduced with jnp.
        # (The prefix slice may cost one copy in this uncommon ragged case;
        # the aligned case passes the original buffers straight through.)
        dt = xf[main:].astype(jnp.float32) - tf[main:].astype(jnp.float32)
        tail_sum = jnp.sum(dt * dt)
        x_main, t_main = xf[:main], tf[:main]
    else:
        tail_sum = jnp.float32(0.0)
        x_main, t_main = xf, tf
    x2d = x_main.reshape(rows, _LANES)     # zero-copy row-major view
    t2d = t_main.reshape(rows, _LANES)

    if needs_clamp:
        def in_map(c, i):
            # Clamp would-be out-of-range blocks onto the last valid block;
            # their contribution is zeroed by the in-kernel row mask.
            return (jnp.minimum(c * blocks_per_split + i, total_blocks - 1), 0)
    else:
        def in_map(c, i):
            return (c * blocks_per_split + i, 0)

    block_in_bytes = tr * _LANES * itemsize
    # Cover 2 inputs x 2 pipeline buffers (+ headroom); cap below v7x's
    # 64 MiB/TC physical VMEM, above v5e's 16 MiB scoped default.
    vmem_limit = int(min(40 << 20, max(32 << 20, 4 * block_in_bytes + (8 << 20))))

    kernel = _make_mse_partial_kernel(rows, tr, blocks_per_split, needs_mask)

    partials = pl.pallas_call(
        kernel,
        out_shape=jax.ShapeDtypeStruct(
            (num_splits, _ACC_SUBLANES, _LANES), jnp.float32),
        grid_spec=pltpu.PrefetchScalarGridSpec(
            num_scalar_prefetch=0,
            grid=(num_splits, blocks_per_split),
            in_specs=[
                pl.BlockSpec((tr, _LANES), in_map),
                pl.BlockSpec((tr, _LANES), in_map),
            ],
            out_specs=pl.BlockSpec(
                (1, _ACC_SUBLANES, _LANES), lambda c, i: (c, 0, 0)),
        ),
        compiler_params=pltpu.CompilerParams(
            dimension_semantics=("parallel", "arbitrary"),
            vmem_limit_bytes=vmem_limit,
        ),
        cost_estimate=pl.CostEstimate(
            flops=3 * main,
            transcendentals=0,
            bytes_accessed=2 * main * itemsize
            + num_splits * _ACC_SUBLANES * _LANES * 4,
        ),
    )(x2d, t2d)

    loss = (jnp.sum(partials) + tail_sum) / jnp.float32(n_elems)
    # Forward pass returns the input unchanged (pass-through), like PyTorch.
    return x, loss


if __name__ == "__main__":
    key = jax.random.PRNGKey(0)
    k1, k2, k3, k4, k5, k6 = jax.random.split(key, 6)

    # Case 1: 128-divisible element count -> pure Pallas path (no copies).
    shape = (2, 4, 16, 16)  # (N, C, H, W) -> 2048 elements
    x = jax.random.normal(k1, shape, dtype=jnp.float32)
    t = jax.random.normal(k2, shape, dtype=jnp.float32)
    out, loss = content_loss_forward(x, t, min_pallas_bytes=0)
    jax.block_until_ready((out, loss))
    ref = jnp.mean((x - t) ** 2)
    assert jnp.allclose(loss, ref, rtol=1e-5, atol=1e-6), (loss, ref)
    assert jnp.array_equal(out, x)

    # Case 2: ragged element count -> Pallas on aligned prefix + jnp tail.
    shape2 = (3, 5, 7, 11)  # 1155 elements
    x2 = jax.random.normal(k3, shape2, dtype=jnp.float32)
    t2 = jax.random.normal(k4, shape2, dtype=jnp.float32)
    out2, loss2 = content_loss_forward(x2, t2, min_pallas_bytes=0)
    jax.block_until_ready((out2, loss2))
    ref2 = jnp.mean((x2 - t2) ** 2)
    assert jnp.allclose(loss2, ref2, rtol=1e-5, atol=1e-6), (loss2, ref2)
    assert jnp.array_equal(out2, x2)

    # Case 3: bf16 inputs exercise the dtype-aware sublane rounding path.
    shape3 = (2, 8, 32, 32)  # 16384 elements
    x3 = jax.random.normal(k5, shape3, dtype=jnp.bfloat16)
    t3 = jax.random.normal(k6, shape3, dtype=jnp.bfloat16)
    out3, loss3 = content_loss_forward(x3, t3, min_pallas_bytes=0)
    jax.block_until_ready((out3, loss3))
    ref3 = jnp.mean((x3.astype(jnp.float32) - t3.astype(jnp.float32)) ** 2)
    assert jnp.allclose(loss3, ref3, rtol=1e-5, atol=1e-6), (loss3, ref3)
    assert jnp.array_equal(out3, x3)

    # Case 4: small-input fast path (default threshold -> fused jnp reduction).
    out4, loss4 = content_loss_forward(x, t)
    jax.block_until_ready((out4, loss4))
    assert jnp.allclose(loss4, ref, rtol=1e-5, atol=1e-6), (loss4, ref)
    assert jnp.array_equal(out4, x)

    print("KERNEL_OK")
</pallas_src>

<mosaic_0001>
module attributes {stable_mosaic.version = 11 : i64} {
  func.func @kernel(%arg0: i32, %arg1: i32, %arg2: memref<16x128xf32, #tpu.memory_space<vmem>>, %arg3: memref<16x128xf32, #tpu.memory_space<vmem>>, %arg4: memref<1x8x128xf32, #tpu.memory_space<vmem>>) attributes {dimension_semantics = [#tpu.dimension_semantics<parallel>, #tpu.dimension_semantics<arbitrary>], iteration_bounds = array<i64: 1, 1>, scalar_prefetch = 0 : i64, scratch_operands = 0 : i64, tpu.core_type = #tpu.core_type<tc>, window_params = [{transform_indices = @transform_0, window_bounds = array<i64: 16, 128>}, {transform_indices = @transform_1, window_bounds = array<i64: 16, 128>}, {transform_indices = @transform_2, window_bounds = array<i64: 1, 8, 128>}]} {
    %c0_i32 = arith.constant 0 : i32
    %0 = arith.cmpi eq, %arg1, %c0_i32 : i32
    %1 = arith.extui %0 : i1 to i32
    %c0_i32_0 = arith.constant 0 : i32
    %2 = arith.cmpi ne, %1, %c0_i32_0 : i32
    scf.if %2 {
      %cst_10 = arith.constant 0.000000e+00 : f32
      %15 = vector.broadcast %cst_10 : f32 to vector<1x8x128xf32>
      %c0_11 = arith.constant 0 : index
      %c0_12 = arith.constant 0 : index
      %c0_13 = arith.constant 0 : index
      %16 = vector.load %arg4[%c0_11, %c0_12, %c0_13] : memref<1x8x128xf32, #tpu.memory_space<vmem>>, vector<1x8x128xf32>
      tpu.vector_store %arg4[%c0_11, %c0_12, %c0_13], %15 {strides = array<i32>} : memref<1x8x128xf32, #tpu.memory_space<vmem>>, vector<1x8x128xf32>,
    } else {
    }
    %c0 = arith.constant 0 : index
    %c0_1 = arith.constant 0 : index
    %3 = vector.load %arg2[%c0, %c0_1] : memref<16x128xf32, #tpu.memory_space<vmem>>, vector<16x128xf32>
    %c0_2 = arith.constant 0 : index
    %c0_3 = arith.constant 0 : index
    %4 = vector.load %arg3[%c0_2, %c0_3] : memref<16x128xf32, #tpu.memory_space<vmem>>, vector<16x128xf32>
    %5 = arith.subf %3, %4 : vector<16x128xf32>
    %6 = arith.mulf %5, %5 : vector<16x128xf32>
    %c0_4 = arith.constant 0 : index
    %c0_5 = arith.constant 0 : index
    %c0_6 = arith.constant 0 : index
    %7 = vector.load %arg4[%c0_4, %c0_5, %c0_6] : memref<1x8x128xf32, #tpu.memory_space<vmem>>, vector<1x8x128xf32>
    %8 = vector.shape_cast %7 : vector<1x8x128xf32> to vector<8x128xf32>
    %9 = vector.shape_cast %6 : vector<16x128xf32> to vector<2x8x128xf32>
    %cst = arith.constant dense<0.000000e+00> : vector<8x128xf32>
    %10 = vector.multi_reduction <add>, %9, %cst [0] : vector<2x8x128xf32> to vector<8x128xf32>
    %11 = arith.addf %8, %10 : vector<8x128xf32>
    %c0_7 = arith.constant 0 : index
    %c0_8 = arith.constant 0 : index
    %c0_9 = arith.constant 0 : index
    %12 = vector.load %arg4[%c0_7, %c0_8, %c0_9] : memref<1x8x128xf32, #tpu.memory_space<vmem>>, vector<1x8x128xf32>
    %13 = vector.shape_cast %12 : vector<1x8x128xf32> to vector<8x128xf32>
    %14 = vector.shape_cast %11 : vector<8x128xf32> to vector<1x8x128xf32>
    tpu.vector_store %arg4[%c0_7, %c0_8, %c0_9], %14 {strides = array<i32>} : memref<1x8x128xf32, #tpu.memory_space<vmem>>, vector<1x8x128xf32>,
    return
  }
  func.func @transform_0(%arg0: i32, %arg1: i32) -> (i32, i32) {
    %c1_i32 = arith.constant 1 : i32
    %0 = arith.muli %arg0, %c1_i32 : i32
    %1 = arith.addi %0, %arg1 : i32
    %c0_i32 = arith.constant 0 : i32
    %c0_i32_0 = arith.constant 0 : i32
    return %1, %c0_i32 : i32, i32
  }
  func.func @transform_1(%arg0: i32, %arg1: i32) -> (i32, i32) {
    %c1_i32 = arith.constant 1 : i32
    %0 = arith.muli %arg0, %c1_i32 : i32
    %1 = arith.addi %0, %arg1 : i32
    %c0_i32 = arith.constant 0 : i32
    %c0_i32_0 = arith.constant 0 : i32
    return %1, %c0_i32 : i32, i32
  }
  func.func @transform_2(%arg0: i32, %arg1: i32) -> (i32, i32, i32) {
    %c0_i32 = arith.constant 0 : i32
    %c0_i32_0 = arith.constant 0 : i32
    %c0_i32_1 = arith.constant 0 : i32
    return %arg0, %c0_i32, %c0_i32_0 : i32, i32, i32
  }
}

</mosaic_0001>

<bundles_post_ra>
// kernel: content_loss_forward.1
= control target key start
LH: loop header
LB: loop body
LE: loop exit
PB: predicated region body
PF: predicated region fallthrough
CT: control target
= control target key end

     0   :  { %s119_s0 = inlined_call_operand.vmem [shape: f32[16,128], index: 0, kind: input, shape index: {}]   ;;  %s120_s1 = inlined_call_operand.vmem [shape: f32[16,128], index: 1, kind: input, shape index: {}]   ;;  %s121_s2 = inlined_call_operand.vmem [shape: f32[1,8,128], index: 2, kind: output, shape index: {}]  }
   0x1   :  { %v60_v0 = vld [vmem:[%s119_s0] sm:$0xff]  ;;  %v61_v1 = vld [vmem:[%s119_s0 + $0x8] sm:$0xff] }
   0x2   :  { %v62_v2 = vld [vmem:[%s120_s1] sm:$0xff]  ;;  %v63_v3 = vld [vmem:[%s120_s1 + $0x8] sm:$0xff] }
   0x3   :  { %v64_v4 = vsub.f32 %v60_v0, %v62_v2  ;;  %v65_v5 = vsub.f32 %v61_v1, %v63_v3 }
   0x5   :  { %v66_v6 = vmul.f32 %v64_v4, %v64_v4  ;;  %v67_v7 = vmul.f32 %v65_v5, %v65_v5 }
   0x7   :  { %v69_v8 = vadd.f32 %v67_v7, %v66_v6 }
   0x9   :  { %71 = vst [vmem:[%s121_s2] sm:$0xff] %v69_v8 }

</bundles_post_ra>
